<compile_context>
chip_gen: v6e
topology: v6e:2x2x1
jax: 0.10.0
libtpu: 0.0.40
codegen_flags: <defaults>
</compile_context>

<pallas_src>
import functools
import numpy as np
import jax
import jax.numpy as jnp
from jax.experimental import pallas as pl
from jax.experimental.pallas import tpu as pltpu


def _round_up(x, m):
    return ((x + m - 1) // m) * m


@functools.lru_cache(maxsize=None)
def _vmem_limit_bytes():
    """<= 75% of physical per-core VMEM; explicit so big tiles compile on v5e too."""
    try:
        cap = int(pltpu.get_tpu_info().vmem_capacity_bytes)
    except Exception:
        cap = 64 << 20  # conservative fallback (v7x-sized VMEM)
    return max(32 << 20, min(cap * 3 // 4, 96 << 20))


def _tile_budget_bytes():
    # Working-set budget used for tile sizing; leaves headroom under the scoped
    # limit for compiler-internal scratch.
    return min(32 << 20, max(4 << 20, _vmem_limit_bytes() // 2))


# Per-element working-set cost used when sizing tiles:
#   2x-buffered input tile + 2x-buffered output tile (input dtype)
#   + ~3 tile-sized f32 intermediates kept live by the body (x_f32 / xc / y).
def _per_elem_bytes(itemsize):
    return 4 * itemsize + 3 * 4


def _pick_rows_tile(rows, d_block, itemsize, budget, min_steps=4):
    """Row tile (multiple of 8, or full extent) + number of grid steps."""
    per_row = d_block * _per_elem_bytes(itemsize)
    br = max(8, (budget // per_row) // 8 * 8)
    # Keep >= min_steps grid steps so megacore (v7x: 2 TCs) gets work on both cores.
    if rows > 8 * min_steps:
        br = min(br, max(8, _round_up(pl.cdiv(rows, min_steps), 8)))
    if br >= rows:
        return rows, 1  # single full-extent block (any row count is legal)
    return br, pl.cdiv(rows, br)


def _pick_lane_tile(l, d, b, itemsize, budget, min_steps=4):
    """Lane (L) tile (multiple of 128, or full extent) + number of L grid steps."""
    per_col = d * _per_elem_bytes(itemsize)
    tl = max(128, (budget // per_col) // 128 * 128)
    # Ensure total grid (b * l_steps) has enough parallel steps for megacore.
    if b < min_steps:
        want = pl.cdiv(min_steps, b)
        if l > 128 * want:
            tl = min(tl, _round_up(pl.cdiv(l, want), 128))
    if tl >= l:
        return l, 1  # full-extent lane block (legal for any l, incl. l < 128)
    return tl, pl.cdiv(l, tl)


# ----------------------------------------------------------------------------
# Kernel 1: LayerNorm over the last dim (non-transposed 'layer' norm)
# ----------------------------------------------------------------------------
def _layernorm_kernel(x_ref, w_ref, b_ref, o_ref, *, d_true):
    # x_ref: (BR, D_block) tile; w_ref/b_ref: (1, D_block)
    x = x_ref[...].astype(jnp.float32)
    d_block = x.shape[-1]
    inv_d = jnp.float32(1.0 / d_true)
    if d_block != d_true:
        # Tail mask as a single (1, d_block) row; broadcast in the wheres.
        lane = jax.lax.broadcasted_iota(jnp.int32, (1, d_block), 1)
        mask = lane < d_true
        xm = jnp.where(mask, x, 0.0)
    else:
        mask = None
        xm = x
    mean = jnp.sum(xm, axis=-1, keepdims=True) * inv_d
    xc = x - mean
    sq = xc * xc if mask is None else jnp.where(mask, xc * xc, 0.0)
    var = jnp.sum(sq, axis=-1, keepdims=True) * inv_d            # biased, like nn.LayerNorm
    inv = jax.lax.rsqrt(var + jnp.float32(1e-5))                 # EUP rsqrt
    y = xc * inv * w_ref[...].astype(jnp.float32) + b_ref[...].astype(jnp.float32)
    o_ref[...] = y.astype(o_ref.dtype)


def layernorm_lastdim(x, weight, bias):
    """LayerNorm over the last dim of x (any leading shape)."""
    shape = x.shape
    d = shape[-1]
    rows = int(np.prod(shape[:-1])) if len(shape) > 1 else 1
    x2 = x.reshape(rows, d)
    itemsize = jnp.dtype(x.dtype).itemsize

    # D layout: D >= 128 -> full-extent last block (no HBM pad; Mosaic handles the
    # ragged lane tail).  D < 128 -> pad to one lane group so stores stay dense;
    # the pad/slice passes are tiny at this size.  Masked reduction covers the tail.
    d_block = d if d >= 128 else 128
    if d_block != d:
        x2 = jnp.pad(x2, ((0, 0), (0, d_block - d)))
        weight = jnp.pad(weight, ((0, d_block - d),))
        bias = jnp.pad(bias, ((0, d_block - d),))
    w2 = weight.reshape(1, d_block)
    b2 = bias.reshape(1, d_block)

    vmem_limit = _vmem_limit_bytes()
    br, n_row_blocks = _pick_rows_tile(rows, d_block, itemsize, _tile_budget_bytes())

    out = pl.pallas_call(
        functools.partial(_layernorm_kernel, d_true=d),
        out_shape=jax.ShapeDtypeStruct((rows, d_block), x.dtype),
        grid_spec=pltpu.PrefetchScalarGridSpec(
            num_scalar_prefetch=0,
            grid=(n_row_blocks,),
            in_specs=[
                pl.BlockSpec((br, d_block), lambda i: (i, 0)),
                pl.BlockSpec((1, d_block), lambda i: (0, 0)),
                pl.BlockSpec((1, d_block), lambda i: (0, 0)),
            ],
            out_specs=pl.BlockSpec((br, d_block), lambda i: (i, 0)),
        ),
        compiler_params=pltpu.CompilerParams(
            dimension_semantics=("parallel",),
            vmem_limit_bytes=vmem_limit,
        ),
    )(x2, w2, b2)

    if d_block != d:
        out = out[:, :d]
    return out.reshape(shape)


# ----------------------------------------------------------------------------
# Kernel 2: TransposedLN (scalar=True) — normalization over the channel dim D
# ----------------------------------------------------------------------------
def _transposed_ln_kernel(x_ref, m_ref, s_ref, o_ref):
    # x_ref: (1, D, TL) tile; m_ref/s_ref: scalar params in SMEM, shape (1,)
    x = x_ref[...].astype(jnp.float32)
    d = x.shape[1]
    inv_d = jnp.float32(1.0 / d)
    mean = jnp.sum(x, axis=1, keepdims=True) * inv_d
    xc = x - mean
    var = jnp.sum(xc * xc, axis=1, keepdims=True) * inv_d        # unbiased=False
    inv_std = jax.lax.rsqrt(var)                                 # no eps: matches torch.std_mean
    y = (s_ref[0] * inv_std) * (xc + m_ref[0])
    o_ref[...] = y.astype(o_ref.dtype)


def transposed_layernorm(x, m_param, s_param):
    """TransposedLN scalar variant. x: (B, D, L...) -> normalized over dim 1."""
    shape = x.shape
    b, d = shape[0], shape[1]
    l = int(np.prod(shape[2:])) if len(shape) > 2 else 1
    x3 = x.reshape(b, d, l)
    itemsize = jnp.dtype(x.dtype).itemsize

    vmem_limit = _vmem_limit_bytes()
    # Whole D stays in the block (the reduction axis is D); L is lane-tiled.
    tl, n_l_blocks = _pick_lane_tile(l, d, b, itemsize, _tile_budget_bytes())

    out = pl.pallas_call(
        _transposed_ln_kernel,
        out_shape=jax.ShapeDtypeStruct((b, d, l), x.dtype),
        grid_spec=pltpu.PrefetchScalarGridSpec(
            num_scalar_prefetch=0,
            grid=(b, n_l_blocks),
            in_specs=[
                pl.BlockSpec((1, d, tl), lambda i, j: (i, 0, j)),
                pl.BlockSpec(memory_space=pltpu.MemorySpace.SMEM),
                pl.BlockSpec(memory_space=pltpu.MemorySpace.SMEM),
            ],
            out_specs=pl.BlockSpec((1, d, tl), lambda i, j: (i, 0, j)),
        ),
        compiler_params=pltpu.CompilerParams(
            dimension_semantics=("parallel", "parallel"),
            vmem_limit_bytes=vmem_limit,
        ),
    )(x3, m_param, s_param)

    return out.reshape(shape)


# ----------------------------------------------------------------------------
# Normalization module wrapper (forward semantics of the PyTorch module)
# ----------------------------------------------------------------------------
class NormalizationPallas:
    def __init__(self, d, transposed=False, _name_='layer'):
        self.d = d
        self.transposed = transposed
        self._name_ = _name_
        if _name_ == 'layer':
            if transposed:
                # TransposedLN scalar params (as in __init__)
                self.m = jnp.zeros((1,), jnp.float32)
                self.s = jnp.ones((1,), jnp.float32)
            else:
                # nn.LayerNorm default affine params
                self.weight = jnp.ones((d,), jnp.float32)
                self.bias = jnp.zeros((d,), jnp.float32)
        elif _name_ == 'none':
            pass
        else:
            # TODO(synk): instance/batch/group norms not implemented (running-stat / training-mode semantics)
            raise NotImplementedError(_name_)

    def __call__(self, x):
        if self._name_ == 'none':
            return x
        if self.transposed:
            # 'b d ... -> b d (...)' then TransposedLN over dim 1 (handled inside)
            return transposed_layernorm(x, self.m, self.s)
        # 'b ... d -> b (...) d' then LayerNorm over last dim (handled inside)
        return layernorm_lastdim(x, self.weight, self.bias)


# ----------------------------------------------------------------------------
# Pure-JAX references (for correctness check)
# ----------------------------------------------------------------------------
def _ref_layernorm(x, w, b, eps=1e-5):
    xf = x.astype(jnp.float32)
    mean = jnp.mean(xf, axis=-1, keepdims=True)
    var = jnp.mean((xf - mean) ** 2, axis=-1, keepdims=True)
    return ((xf - mean) / jnp.sqrt(var + eps) * w + b).astype(x.dtype)


def _ref_transposed_ln(x, m_p, s_p):
    xf = x.astype(jnp.float32)
    mean = jnp.mean(xf, axis=1, keepdims=True)
    std = jnp.sqrt(jnp.mean((xf - mean) ** 2, axis=1, keepdims=True))
    return (s_p[0] / std * (xf - mean + m_p[0])).astype(x.dtype)


if __name__ == "__main__":
    key = jax.random.PRNGKey(0)
    k1, k2, k3, k4, k5, k6 = jax.random.split(key, 6)

    B, L, D = 2, 16, 32

    # --- default config: _name_='layer', transposed=False; input (B, L, D) ---
    x_ln = jax.random.normal(k1, (B, L, D), dtype=jnp.float32)
    norm_ln = NormalizationPallas(D, transposed=False, _name_='layer')
    y_ln = jax.block_until_ready(norm_ln(x_ln))
    y_ln_ref = _ref_layernorm(x_ln, norm_ln.weight, norm_ln.bias)
    assert y_ln.shape == x_ln.shape and y_ln.dtype == x_ln.dtype
    np.testing.assert_allclose(np.asarray(y_ln), np.asarray(y_ln_ref), rtol=2e-5, atol=2e-5)

    # --- ragged D >= 128 (no-pad full-extent last block) + ragged rows: (3, 5, 160) ---
    x_ln2 = jax.random.normal(k3, (3, 5, 160), dtype=jnp.float32)
    norm_ln2 = NormalizationPallas(160, transposed=False, _name_='layer')
    y_ln2 = jax.block_until_ready(norm_ln2(x_ln2))
    y_ln2_ref = _ref_layernorm(x_ln2, norm_ln2.weight, norm_ln2.bias)
    np.testing.assert_allclose(np.asarray(y_ln2), np.asarray(y_ln2_ref), rtol=2e-5, atol=2e-5)

    # --- multi-step row grid with a partial last row block: (4, 300, 256) ---
    x_ln3 = jax.random.normal(k5, (4, 300, 256), dtype=jnp.float32)
    norm_ln3 = NormalizationPallas(256, transposed=False, _name_='layer')
    y_ln3 = jax.block_until_ready(norm_ln3(x_ln3))
    y_ln3_ref = _ref_layernorm(x_ln3, norm_ln3.weight, norm_ln3.bias)
    np.testing.assert_allclose(np.asarray(y_ln3), np.asarray(y_ln3_ref), rtol=2e-5, atol=2e-5)

    # --- transposed config: _name_='layer', transposed=True; input (B, D, L) ---
    x_t = jax.random.normal(k2, (B, D, L), dtype=jnp.float32)
    norm_t = NormalizationPallas(D, transposed=True, _name_='layer')
    y_t = jax.block_until_ready(norm_t(x_t))
    y_t_ref = _ref_transposed_ln(x_t, norm_t.m, norm_t.s)
    assert y_t.shape == x_t.shape and y_t.dtype == x_t.dtype
    np.testing.assert_allclose(np.asarray(y_t), np.asarray(y_t_ref), rtol=2e-5, atol=2e-5)

    # --- transposed with multi-axis spatial + small L: (2, 32, 5, 5) ---
    x_t2 = jax.random.normal(k4, (2, 32, 5, 5), dtype=jnp.float32)
    norm_t2 = NormalizationPallas(32, transposed=True, _name_='layer')
    y_t2 = jax.block_until_ready(norm_t2(x_t2))
    y_t2_ref = _ref_transposed_ln(x_t2.reshape(2, 32, 25), norm_t2.m, norm_t2.s).reshape(2, 32, 5, 5)
    np.testing.assert_allclose(np.asarray(y_t2), np.asarray(y_t2_ref), rtol=2e-5, atol=2e-5)

    # --- transposed with ragged L > 128 (lane-tiled grid, partial last lane block): (2, 64, 300) ---
    x_t3 = jax.random.normal(k6, (2, 64, 300), dtype=jnp.float32)
    norm_t3 = NormalizationPallas(64, transposed=True, _name_='layer')
    y_t3 = jax.block_until_ready(norm_t3(x_t3))
    y_t3_ref = _ref_transposed_ln(x_t3, norm_t3.m, norm_t3.s)
    np.testing.assert_allclose(np.asarray(y_t3), np.asarray(y_t3_ref), rtol=2e-5, atol=2e-5)

    # --- identity config ---
    norm_none = NormalizationPallas(D, transposed=False, _name_='none')
    assert norm_none(x_ln) is x_ln

    print("KERNEL_OK")
</pallas_src>

<mosaic_0001>
module attributes {stable_mosaic.version = 11 : i64} {
  func.func @_layernorm_kernel(%arg0: i32, %arg1: memref<32x128xf32, #tpu.memory_space<vmem>>, %arg2: memref<1x128xf32, #tpu.memory_space<vmem>>, %arg3: memref<1x128xf32, #tpu.memory_space<vmem>>, %arg4: memref<32x128xf32, #tpu.memory_space<vmem>>) attributes {dimension_semantics = [#tpu.dimension_semantics<parallel>], iteration_bounds = array<i64: 1>, scalar_prefetch = 0 : i64, scratch_operands = 0 : i64, tpu.core_type = #tpu.core_type<tc>, window_params = [{transform_indices = @transform_0, window_bounds = array<i64: 32, 128>}, {pipeline_mode = #tpu.pipeline_mode<synchronous>, transform_indices = @transform_1, window_bounds = array<i64: 1, 128>}, {pipeline_mode = #tpu.pipeline_mode<synchronous>, transform_indices = @transform_2, window_bounds = array<i64: 1, 128>}, {transform_indices = @transform_3, window_bounds = array<i64: 32, 128>}]} {
    %c0 = arith.constant 0 : index
    %c0_0 = arith.constant 0 : index
    %0 = vector.load %arg1[%c0, %c0_0] : memref<32x128xf32, #tpu.memory_space<vmem>>, vector<32x128xf32>
    %1 = tpu.iota {dimensions = array<i32: 1>} : vector<1x128xi32>
    %c32_i32 = arith.constant 32 : i32
    %2 = vector.broadcast %c32_i32 : i32 to vector<1x128xi32>
    %3 = arith.cmpi slt, %1, %2 : vector<1x128xi32>
    %cst = arith.constant 0.000000e+00 : f32
    %4 = vector.shape_cast %3 : vector<1x128xi1> to vector<1x128xi1>
    %5 = vector.broadcast %4 : vector<1x128xi1> to vector<32x128xi1>
    %6 = vector.broadcast %cst : f32 to vector<32x128xf32>
    %7 = arith.select %5, %0, %6 : vector<32x128xi1>, vector<32x128xf32>
    %cst_1 = arith.constant dense<0.000000e+00> : vector<32xf32>
    %8 = vector.multi_reduction <add>, %7, %cst_1 [1] : vector<32x128xf32> to vector<32xf32>
    %9 = vector.shape_cast %8 : vector<32xf32> to vector<32x1xf32>
    %cst_2 = arith.constant 3.125000e-02 : f32
    %10 = vector.broadcast %cst_2 : f32 to vector<32x1xf32>
    %11 = arith.mulf %9, %10 : vector<32x1xf32>
    %12 = vector.broadcast %11 : vector<32x1xf32> to vector<32x128xf32>
    %13 = arith.subf %0, %12 : vector<32x128xf32>
    %14 = arith.mulf %13, %13 : vector<32x128xf32>
    %cst_3 = arith.constant 0.000000e+00 : f32
    %15 = vector.shape_cast %3 : vector<1x128xi1> to vector<1x128xi1>
    %16 = vector.broadcast %15 : vector<1x128xi1> to vector<32x128xi1>
    %17 = vector.broadcast %cst_3 : f32 to vector<32x128xf32>
    %18 = arith.select %16, %14, %17 : vector<32x128xi1>, vector<32x128xf32>
    %cst_4 = arith.constant dense<0.000000e+00> : vector<32xf32>
    %19 = vector.multi_reduction <add>, %18, %cst_4 [1] : vector<32x128xf32> to vector<32xf32>
    %20 = vector.shape_cast %19 : vector<32xf32> to vector<32x1xf32>
    %cst_5 = arith.constant 3.125000e-02 : f32
    %21 = vector.broadcast %cst_5 : f32 to vector<32x1xf32>
    %22 = arith.mulf %20, %21 : vector<32x1xf32>
    %cst_6 = arith.constant 9.99999974E-6 : f32
    %23 = vector.broadcast %cst_6 : f32 to vector<32x1xf32>
    %24 = arith.addf %22, %23 : vector<32x1xf32>
    %25 = math.rsqrt %24 : vector<32x1xf32>
    %26 = vector.broadcast %25 : vector<32x1xf32> to vector<32x128xf32>
    %27 = arith.mulf %13, %26 : vector<32x128xf32>
    %c0_7 = arith.constant 0 : index
    %c0_8 = arith.constant 0 : index
    %28 = vector.load %arg2[%c0_7, %c0_8] : memref<1x128xf32, #tpu.memory_space<vmem>>, vector<1x128xf32>
    %29 = vector.broadcast %28 : vector<1x128xf32> to vector<32x128xf32>
    %30 = arith.mulf %27, %29 : vector<32x128xf32>
    %c0_9 = arith.constant 0 : index
    %c0_10 = arith.constant 0 : index
    %31 = vector.load %arg3[%c0_9, %c0_10] : memref<1x128xf32, #tpu.memory_space<vmem>>, vector<1x128xf32>
    %32 = vector.broadcast %31 : vector<1x128xf32> to vector<32x128xf32>
    %33 = arith.addf %30, %32 : vector<32x128xf32>
    %c0_11 = arith.constant 0 : index
    %c0_12 = arith.constant 0 : index
    %34 = vector.load %arg4[%c0_11, %c0_12] : memref<32x128xf32, #tpu.memory_space<vmem>>, vector<32x128xf32>
    tpu.vector_store %arg4[%c0_11, %c0_12], %33 {strides = array<i32>} : memref<32x128xf32, #tpu.memory_space<vmem>>, vector<32x128xf32>,
    return
  }
  func.func @transform_0(%arg0: i32) -> (i32, i32) {
    %c0_i32 = arith.constant 0 : i32
    %c0_i32_0 = arith.constant 0 : i32
    return %arg0, %c0_i32 : i32, i32
  }
  func.func @transform_1(%arg0: i32) -> (i32, i32) {
    %c0_i32 = arith.constant 0 : i32
    %c0_i32_0 = arith.constant 0 : i32
    %c0_i32_1 = arith.constant 0 : i32
    return %c0_i32, %c0_i32_0 : i32, i32
  }
  func.func @transform_2(%arg0: i32) -> (i32, i32) {
    %c0_i32 = arith.constant 0 : i32
    %c0_i32_0 = arith.constant 0 : i32
    %c0_i32_1 = arith.constant 0 : i32
    return %c0_i32, %c0_i32_0 : i32, i32
  }
  func.func @transform_3(%arg0: i32) -> (i32, i32) {
    %c0_i32 = arith.constant 0 : i32
    %c0_i32_0 = arith.constant 0 : i32
    return %arg0, %c0_i32 : i32, i32
  }
}

</mosaic_0001>

<bundles_post_ra>
// kernel: tpu_custom_call.1
= control target key start
LH: loop header
LB: loop body
LE: loop exit
PB: predicated region body
PF: predicated region fallthrough
CT: control target
= control target key end

     0   :  { %8 = vsyncpa [#allocation3], 0  ;;  %s241_s0 = inlined_call_operand.hbm [shape: f32[32,128], index: 0, kind: input, shape index: {}]   ;;  %s242_s1 = inlined_call_operand.vmem [shape: f32[1,128], index: 1, kind: input, shape index: {}]   ;;  %s243_s2 = inlined_call_operand.vmem [shape: f32[1,128], index: 2, kind: input, shape index: {}]   ;;  %s244_s3 = inlined_call_operand.hbm [shape: f32[32,128], index: 3, kind: output, shape index: {}]  }
   0x1   :  { %9 = vsyncpa [#allocation4], 0  ;;  %s191_s12 = smov [#allocation2]  }
   0x2   :  { %s15_s13 = sshll.u32 %s191_s12, 4  ;;  %s16_s13 = int_to_ptr.vmem [resolvable:$true] %s15_s13 }
   0x3   :  { %s155_s14 = scalar_lea.vmem %s16_s13, 512  ;;  %p160_p1 = scmp.lt.s32.totalorder %s16_s13, %s16_s13 }
   0x4   :  { %p156_p0 = scmp.ne.s32.totalorder %s16_s13, %s155_s14  ;;  %p161_p2 = scmp.lt.s32.totalorder %s155_s14, %s155_s14 }
   0x6   :  { %p162_p3 = por %p161_p2, %p160_p1 }
   0x8   :  { %p163_p4 = pnand %p162_p3, %p156_p0 }
   0xa   :  { %166 = shalt.err (!%p163_p4)
}
   0xb   :  { %s192_s15 = smov 128   ;;  %s193_s16 = smov 8  }
   0xc   :  { %21 = dma.hbm_to_vmem [thread:$0]  %s241_s0, 512, %s16_s13, [#allocation3], %s192_s15, %s192_s15, %s193_s16  }
   0xd   :  { %187 = dma.done.wait [#allocation3], 512  }
   0xe   :  { %188 = vsyncadd [#allocation3], 4294966784  ;;  %v33_v0 = vlaneseq  ;;  %v29_v2 = vld [vmem:[#allocation2] sm:$0xff]  ;;  %v31_v3 = vld [vmem:[#allocation2 + $0x10] sm:$0xff]  ;;  %s194_s22 = smov [#allocation5]  }
   0xf   :  { %v30_v4 = vld [vmem:[#allocation2 + $0x8] sm:$0xff]  ;;  %v32_v7 = vld [vmem:[#allocation2 + $0x18] sm:$0xff]  ;;  %v133_v43 = vld [vmem:[%s242_s1] ss:$0 sm:$0xff]  ;;  %s121_s1 = sshll.u32 %s194_s22, 4  ;;  %s122_s1 = int_to_ptr.vmem [resolvable:$true] %s121_s1 }
  0x10   :  { %v34_v1 = vand.u32 127, %v33_v0  ;;  %v134_v45 = vld [vmem:[%s243_s2] ss:$0 sm:$0xff]  ;;  %s167_s2 = scalar_lea.vmem %s122_s1, 512  ;;  %p172_p6 = scmp.lt.s32.totalorder %s122_s1, %s122_s1 }
  0x11   :  { %p168_p5 = scmp.ne.s32.totalorder %s122_s1, %s167_s2  ;;  %p173_p7 = scmp.lt.s32.totalorder %s167_s2, %s167_s2 }
  0x12   :  { %vm35_vm0 = vcmp.lt.s32.totalorder %v34_v1, 32 }
  0x13   :  { %v38_v5 = vsel %vm35_vm0, %v29_v2, 0.0  ;;  %v40_v6 = vsel %vm35_vm0, %v31_v3, 0.0  ;;  %v39_v8 = vsel %vm35_vm0, %v30_v4, 0.0  ;;  %v41_v9 = vsel %vm35_vm0, %v32_v7, 0.0  ;;  %p174_p8 = por %p173_p7, %p172_p6 }
  0x14   :  { %42 = vadd.xlane.f32.xlu0 %v38_v5  ;;  %46 = vadd.xlane.f32.xlu1 %v40_v6 }
  0x15   :  { %p175_p9 = pnand %p174_p8, %p168_p5 }
  0x18   :  { %44 = vadd.xlane.f32.xlu0 %v39_v8  ;;  %48 = vadd.xlane.f32.xlu1 %v41_v9 }
  0x9d   :  { %v43_v10 = vpop.xlane.xlu0 %42  ;;  %v47_v11 = vpop.xlane.xlu1 %46 }
  0x9e   :  { %v50_v12 = vmul.f32 0.03125, %v43_v10  ;;  %v52_v13 = vmul.f32 0.03125, %v47_v11 }
  0xa0   :  { %v54_v14 = vsub.f32 %v29_v2, %v50_v12  ;;  %v56_v15 = vsub.f32 %v31_v3, %v52_v13 }
  0xa1   :  { %v45_v16 = vpop.xlane.xlu0 %44  ;;  %v49_v17 = vpop.xlane.xlu1 %48 }
  0xa2   :  { %v51_v18 = vmul.f32 0.03125, %v45_v16  ;;  %v53_v19 = vmul.f32 0.03125, %v49_v17  ;;  %v58_v20 = vmul.f32 %v54_v14, %v54_v14  ;;  %v60_v21 = vmul.f32 %v56_v15, %v56_v15 }
  0xa4   :  { %v55_v22 = vsub.f32 %v30_v4, %v51_v18  ;;  %v57_v23 = vsub.f32 %v32_v7, %v53_v19  ;;  %v62_v24 = vsel %vm35_vm0, %v58_v20, 0.0  ;;  %v64_v25 = vsel %vm35_vm0, %v60_v21, 0.0 }
  0xa5   :  { %66 = vadd.xlane.f32.xlu0 %v62_v24 }
  0xa6   :  { %v59_v26 = vmul.f32 %v55_v22, %v55_v22  ;;  %v61_v27 = vmul.f32 %v57_v23, %v57_v23 }
  0xa8   :  { %v63_v28 = vsel %vm35_vm0, %v59_v26, 0.0  ;;  %v65_v29 = vsel %vm35_vm0, %v61_v27, 0.0 }
  0xa9   :  { %70 = vadd.xlane.f32.xlu0 %v64_v25  ;;  %68 = vadd.xlane.f32.xlu1 %v63_v28 }
  0xad   :  { %72 = vadd.xlane.f32.xlu1 %v65_v29 }
 0x12e   :  { %v67_v30 = vpop.xlane.xlu0 %66 }
 0x12f   :  { %v74_v31 = vmul.f32 0.03125, %v67_v30 }
 0x131   :  { %v78_v32 = vadd.f32 1e-05, %v74_v31 }
 0x132   :  { %v69_v33 = vpop.xlane.xlu1 %68  ;;  %v71_v34 = vpop.xlane.xlu0 %70 }
 0x133   :  { %139 = vrsqrt.f32 %v78_v32  ;;  %v75_v35 = vmul.f32 0.03125, %v69_v33  ;;  %v76_v36 = vmul.f32 0.03125, %v71_v34 }
 0x135   :  { %v79_v37 = vadd.f32 1e-05, %v75_v35  ;;  %v80_v38 = vadd.f32 1e-05, %v76_v36 }
 0x136   :  { %v73_v39 = vpop.xlane.xlu1 %72 }
 0x137   :  { %141 = vrsqrt.f32 %v79_v37  ;;  %v77_v40 = vmul.f32 0.03125, %v73_v39 }
 0x138   :  { %143 = vrsqrt.f32 %v80_v38 }
 0x139   :  { %v81_v41 = vadd.f32 1e-05, %v77_v40 }
 0x13b   :  { %145 = vrsqrt.f32 %v81_v41 }
 0x140   :  { %v140_v42 = vpop.eup %139 }
 0x141   :  { %v86_v44 = vmul.f32 %v140_v42, %v54_v14 }
 0x143   :  { %v97_v46 = vmul.f32 %v133_v43, %v86_v44 }
 0x144   :  { %v142_v47 = vpop.eup %141 }
 0x145   :  { %v144_v48 = vpop.eup %143  ;;  %v87_v49 = vmul.f32 %v142_v47, %v55_v22  ;;  %v108_v50 = vadd.f32 %v134_v45, %v97_v46 }
 0x146   :  { %v88_v51 = vmul.f32 %v144_v48, %v56_v15 }
 0x147   :  { %v98_v52 = vmul.f32 %v133_v43, %v87_v49  ;;  %112 = vst [vmem:[#allocation5] sm:$0xff] %v108_v50 }
 0x148   :  { %v146_v53 = vpop.eup %145  ;;  %v99_v54 = vmul.f32 %v133_v43, %v88_v51 }
 0x149   :  { %v89_v55 = vmul.f32 %v146_v53, %v57_v23  ;;  %v109_v56 = vadd.f32 %v134_v45, %v98_v52 }
 0x14a   :  { %v110_v57 = vadd.f32 %v134_v45, %v99_v54 }
 0x14b   :  { %v100_v58 = vmul.f32 %v133_v43, %v89_v55  ;;  %113 = vst [vmem:[#allocation5 + $0x8] sm:$0xff] %v109_v56 }
 0x14c   :  { %114 = vst [vmem:[#allocation5 + $0x10] sm:$0xff] %v110_v57 }
 0x14d   :  { %v111_v59 = vadd.f32 %v134_v45, %v100_v58 }
 0x14f   :  { %115 = vst [vmem:[#allocation5 + $0x18] sm:$0xff] %v111_v59 }
 0x150   :  { %178 = shalt.err (!%p175_p9)
}
 0x151   :  { %127 = dma.vmem_to_hbm [thread:$0]  %s122_s1, 512, %s244_s3, [#allocation4], %s192_s15, %s192_s15, %s193_s16  }
 0x152   :  { %189 = dma.done.wait [#allocation4], 512  }
 0x153   :  { %190 = vsyncadd [#allocation4], 4294966784 }
 0x154   :  { %131 = vsyncpa [#allocation3], 1 }
 0x155   :  { %132 = vsyncpa [#allocation4], 1 }

</bundles_post_ra>
